<compile_context>
chip_gen: v7x
topology: tpu7x:2x2x1
jax: 0.10.0
libtpu: 0.0.40
codegen_flags: <defaults>
</compile_context>

<pallas_src>
import jax
import jax.numpy as jnp
from jax.experimental import pallas as pl
from jax.experimental.pallas import tpu as pltpu

LANE = 128                      # vreg lane width
SUBLANE = 8                     # f32 sublane count
DEFAULT_BATCH_TILE = 2048       # rows per grid step (review: 1024-2048)
MIN_ROWS_FOR_TC_SPLIT = 1024    # force >= 2 grid steps above this (v7x: 2 TCs)
VMEM_LIMIT_BYTES = 32 * 1024 * 1024


def _cdiv(a, b):
    return (a + b - 1) // b


def _round_up(n, m):
    return ((n + m - 1) // m) * m


def _pad2d(a, rows, cols, dtype):
    out = jnp.zeros((rows, cols), dtype)
    return out.at[: a.shape[0], : a.shape[1]].set(a.astype(dtype))


def actor_kernel(ma_ref, x_ref, w1_ref, b1_ref, w2_ref, b2_ref, w3_ref, b3_ref,
                 o_ref):
    """One batch tile: three fused (matmul + bias + nonlinearity) layers."""
    max_action = ma_ref[0]  # runtime scalar from SMEM

    # Layer 1: (tb, S) @ (S, H1p) -> f32 accum; bias + ReLU in f32, keep result bf16.
    h1 = jnp.dot(x_ref[...].astype(jnp.bfloat16), w1_ref[...],
                 preferred_element_type=jnp.float32)
    h1 = jnp.maximum(h1 + b1_ref[...], 0.0).astype(jnp.bfloat16)

    # Layer 2: (tb, H1p) @ (H1p, H2p)
    h2 = jnp.dot(h1, w2_ref[...], preferred_element_type=jnp.float32)
    h2 = jnp.maximum(h2 + b2_ref[...], 0.0).astype(jnp.bfloat16)

    # Layer 3: (tb, H2p) @ (H2p, Ap) -> max_action * tanh (f32 math, bf16 store)
    h3 = jnp.dot(h2, w3_ref[...], preferred_element_type=jnp.float32)
    o_ref[...] = (max_action * jnp.tanh(h3 + b3_ref[...])).astype(o_ref.dtype)


def prepare_actor_params(params, weight_dtype=jnp.bfloat16):
    """Zero-pad weights/biases to lane-aligned shapes and cast weights to bf16.

    Done once at init time.  Zero-padded weight rows/cols and zero bias lanes keep
    the padded hidden lanes at exactly 0 through ReLU, so the unpadded slice of the
    output is identical to the unpadded math.
    """
    w1, b1, w2, b2, w3, b3 = params
    s, h1 = w1.shape
    _, h2 = w2.shape
    _, a = w3.shape
    h1p, h2p, ap = _round_up(h1, LANE), _round_up(h2, LANE), _round_up(a, LANE)

    padded = (
        _pad2d(w1, s, h1p, weight_dtype),
        _pad2d(b1.reshape(1, -1), 1, h1p, jnp.float32),
        _pad2d(w2, h1p, h2p, weight_dtype),
        _pad2d(b2.reshape(1, -1), 1, h2p, jnp.float32),
        _pad2d(w3, h2p, ap, weight_dtype),
        _pad2d(b3.reshape(1, -1), 1, ap, jnp.float32),
    )
    return padded, a


def _choose_batch_tiling(batch, batch_tile):
    """Balanced batch tiling: pick step count first, then an even tile size."""
    steps = _cdiv(batch, batch_tile)
    # v7x has 2 TensorCores; give the "parallel" batch axis something to split when
    # the batch is large enough that the extra grid step is free.
    if steps == 1 and batch >= MIN_ROWS_FOR_TC_SPLIT:
        steps = 2
    tile_b = _round_up(_cdiv(batch, steps), SUBLANE)
    b_pad = tile_b * steps
    return tile_b, b_pad, steps


def actor_forward(x, padded_params, action_dim, max_action,
                  batch_tile=DEFAULT_BATCH_TILE):
    w1, b1, w2, b2, w3, b3 = padded_params
    batch, state_dim = x.shape
    h1p, h2p, ap = w1.shape[1], w2.shape[1], w3.shape[1]

    tile_b, b_pad, steps = _choose_batch_tiling(batch, batch_tile)
    if b_pad != batch:
        x = jnp.pad(x, ((0, b_pad - batch), (0, 0)))
    grid = (steps,)

    ma = jnp.asarray([max_action], jnp.float32)  # SMEM scalar, no recompile per value

    # Advisory cost estimate so XLA schedules/overlaps the custom call sensibly.
    flops = 2 * b_pad * (state_dim * h1p + h1p * h2p + h2p * ap)
    transcendentals = b_pad * ap
    bytes_accessed = (
        b_pad * state_dim * 4                               # x (f32)
        + (state_dim * h1p + h1p * h2p + h2p * ap) * 2      # bf16 weights
        + (h1p + h2p + ap) * 4                              # f32 biases
        + b_pad * ap * 2                                    # bf16 output
    )

    const = lambda i: (0, 0)  # weights/biases: same block every grid step (resident)
    out = pl.pallas_call(
        actor_kernel,
        out_shape=jax.ShapeDtypeStruct((b_pad, ap), jnp.bfloat16),
        grid=grid,
        in_specs=[
            pl.BlockSpec(memory_space=pltpu.MemorySpace.SMEM),    # max_action
            pl.BlockSpec((tile_b, state_dim), lambda i: (i, 0)),  # x tile
            pl.BlockSpec((state_dim, h1p), const),                # w1
            pl.BlockSpec((1, h1p), const),                        # b1
            pl.BlockSpec((h1p, h2p), const),                      # w2
            pl.BlockSpec((1, h2p), const),                        # b2
            pl.BlockSpec((h2p, ap), const),                       # w3
            pl.BlockSpec((1, ap), const),                         # b3
        ],
        out_specs=pl.BlockSpec((tile_b, ap), lambda i: (i, 0)),
        compiler_params=pltpu.CompilerParams(
            dimension_semantics=("parallel",),                    # v7x: 2 TCs
            vmem_limit_bytes=VMEM_LIMIT_BYTES),
        cost_estimate=pl.CostEstimate(
            flops=flops, transcendentals=transcendentals,
            bytes_accessed=bytes_accessed),
    )(ma, x, w1, b1, w2, b2, w3, b3)

    # Padded rows (>= batch) hold tanh(bias) garbage and padded lanes hold tanh(0);
    # both are sliced off here.  Upcast the tiny real slice back to f32.
    return out[:batch, :action_dim].astype(jnp.float32)


def init_linear(key, fan_in, fan_out):
    # Mimic PyTorch nn.Linear default init: U(-1/sqrt(fan_in), 1/sqrt(fan_in))
    kw, kb = jax.random.split(key)
    bound = 1.0 / (fan_in ** 0.5)
    w = jax.random.uniform(kw, (fan_in, fan_out), jnp.float32, -bound, bound)
    b = jax.random.uniform(kb, (fan_out,), jnp.float32, -bound, bound)
    return w, b


if __name__ == "__main__":
    key = jax.random.PRNGKey(0)
    k_x, k1, k2, k3 = jax.random.split(key, 4)

    batch = 2
    state_dim = 16
    action_dim = 4
    h1_units = 400
    h2_units = 300
    max_action = 1.0

    w1, b1 = init_linear(k1, state_dim, h1_units)
    w2, b2 = init_linear(k2, h1_units, h2_units)
    w3, b3 = init_linear(k3, h2_units, action_dim)
    params = (w1, b1, w2, b2, w3, b3)

    padded_params, adim = prepare_actor_params(params)

    x = jax.random.normal(k_x, (batch, state_dim), jnp.float32)

    out = actor_forward(x, padded_params, adim, max_action)
    jax.block_until_ready(out)
    assert out.shape == (batch, action_dim)

    # Matched-precision reference (bf16 operands, f32 accumulation, bf16 hidden/output
    # staging — mirrors the kernel math).
    def ref_mixed(xv, p):
        rw1, rb1, rw2, rb2, rw3, rb3 = p
        h = jnp.dot(xv.astype(jnp.bfloat16), rw1.astype(jnp.bfloat16),
                    preferred_element_type=jnp.float32) + rb1
        h = jnp.maximum(h, 0.0).astype(jnp.bfloat16)
        h = jnp.dot(h, rw2.astype(jnp.bfloat16),
                    preferred_element_type=jnp.float32) + rb2
        h = jnp.maximum(h, 0.0).astype(jnp.bfloat16)
        h = jnp.dot(h, rw3.astype(jnp.bfloat16),
                    preferred_element_type=jnp.float32) + rb3
        return max_action * jnp.tanh(h)

    ref_bf16 = ref_mixed(x, params)
    # bf16 output quantization (~4e-3 for |y| <= 1) + accumulation-order differences.
    assert jnp.allclose(out, ref_bf16, atol=1e-2, rtol=1e-2)

    # Full-f32 semantic reference (original PyTorch math); loose tol from bf16 path.
    ref_f32 = jnp.maximum(x @ w1 + b1, 0.0)
    ref_f32 = jnp.maximum(ref_f32 @ w2 + b2, 0.0)
    ref_f32 = max_action * jnp.tanh(ref_f32 @ w3 + b3)
    assert jnp.allclose(out, ref_f32, atol=5e-2, rtol=5e-2)

    print("KERNEL_OK")
</pallas_src>

<mosaic_0001>
module attributes {stable_mosaic.version = 11 : i64} {
  func.func @actor_kernel(%arg0: i32, %arg1: memref<1xf32, #tpu.memory_space<smem>>, %arg2: memref<8x16xf32, #tpu.memory_space<vmem>>, %arg3: memref<16x512xbf16, #tpu.memory_space<vmem>>, %arg4: memref<1x512xf32, #tpu.memory_space<vmem>>, %arg5: memref<512x384xbf16, #tpu.memory_space<vmem>>, %arg6: memref<1x384xf32, #tpu.memory_space<vmem>>, %arg7: memref<384x128xbf16, #tpu.memory_space<vmem>>, %arg8: memref<1x128xf32, #tpu.memory_space<vmem>>, %arg9: memref<8x128xbf16, #tpu.memory_space<vmem>>) attributes {dimension_semantics = [#tpu.dimension_semantics<parallel>], iteration_bounds = array<i64: 1>, scalar_prefetch = 0 : i64, scratch_operands = 0 : i64, tpu.core_type = #tpu.core_type<tc>, window_params = [{transform_indices = @transform_0, window_bounds = array<i64: 1>}, {transform_indices = @transform_1, window_bounds = array<i64: 8, 16>}, {pipeline_mode = #tpu.pipeline_mode<synchronous>, transform_indices = @transform_2, window_bounds = array<i64: 16, 512>}, {pipeline_mode = #tpu.pipeline_mode<synchronous>, transform_indices = @transform_3, window_bounds = array<i64: 1, 512>}, {pipeline_mode = #tpu.pipeline_mode<synchronous>, transform_indices = @transform_4, window_bounds = array<i64: 512, 384>}, {pipeline_mode = #tpu.pipeline_mode<synchronous>, transform_indices = @transform_5, window_bounds = array<i64: 1, 384>}, {pipeline_mode = #tpu.pipeline_mode<synchronous>, transform_indices = @transform_6, window_bounds = array<i64: 384, 128>}, {pipeline_mode = #tpu.pipeline_mode<synchronous>, transform_indices = @transform_7, window_bounds = array<i64: 1, 128>}, {transform_indices = @transform_8, window_bounds = array<i64: 8, 128>}]} {
    %c0 = arith.constant 0 : index
    %0 = memref.load %arg1[%c0] : memref<1xf32, #tpu.memory_space<smem>>
    %c0_0 = arith.constant 0 : index
    %c0_1 = arith.constant 0 : index
    %1 = vector.load %arg2[%c0_0, %c0_1] : memref<8x16xf32, #tpu.memory_space<vmem>>, vector<8x16xf32>
    %2 = arith.truncf %1 : vector<8x16xf32> to vector<8x16xbf16>
    %c0_2 = arith.constant 0 : index
    %c0_3 = arith.constant 0 : index
    %3 = vector.load %arg3[%c0_2, %c0_3] : memref<16x512xbf16, #tpu.memory_space<vmem>>, vector<16x512xbf16>
    %cst = arith.constant dense<0.000000e+00> : vector<8x512xf32>
    %4 = tpu.matmul %2, %3, %cst {dimension_numbers = #tpu.dot_dimension_numbers<[1], [0], [0], [1], [0, 0, 1, 1], [], []>} : vector<8x16xbf16>, vector<16x512xbf16>, vector<8x512xf32> -> vector<8x512xf32>
    %c0_4 = arith.constant 0 : index
    %c0_5 = arith.constant 0 : index
    %5 = vector.load %arg4[%c0_4, %c0_5] : memref<1x512xf32, #tpu.memory_space<vmem>>, vector<1x512xf32>
    %6 = vector.broadcast %5 : vector<1x512xf32> to vector<8x512xf32>
    %7 = arith.addf %4, %6 : vector<8x512xf32>
    %cst_6 = arith.constant 0.000000e+00 : f32
    %8 = vector.broadcast %cst_6 : f32 to vector<8x512xf32>
    %9 = arith.maximumf %7, %8 : vector<8x512xf32>
    %10 = arith.truncf %9 : vector<8x512xf32> to vector<8x512xbf16>
    %c0_7 = arith.constant 0 : index
    %c0_8 = arith.constant 0 : index
    %11 = vector.load %arg5[%c0_7, %c0_8] : memref<512x384xbf16, #tpu.memory_space<vmem>>, vector<512x384xbf16>
    %cst_9 = arith.constant dense<0.000000e+00> : vector<8x384xf32>
    %12 = tpu.matmul %10, %11, %cst_9 {dimension_numbers = #tpu.dot_dimension_numbers<[1], [0], [0], [1], [0, 0, 1, 1], [], []>} : vector<8x512xbf16>, vector<512x384xbf16>, vector<8x384xf32> -> vector<8x384xf32>
    %c0_10 = arith.constant 0 : index
    %c0_11 = arith.constant 0 : index
    %13 = vector.load %arg6[%c0_10, %c0_11] : memref<1x384xf32, #tpu.memory_space<vmem>>, vector<1x384xf32>
    %14 = vector.broadcast %13 : vector<1x384xf32> to vector<8x384xf32>
    %15 = arith.addf %12, %14 : vector<8x384xf32>
    %cst_12 = arith.constant 0.000000e+00 : f32
    %16 = vector.broadcast %cst_12 : f32 to vector<8x384xf32>
    %17 = arith.maximumf %15, %16 : vector<8x384xf32>
    %18 = arith.truncf %17 : vector<8x384xf32> to vector<8x384xbf16>
    %c0_13 = arith.constant 0 : index
    %c0_14 = arith.constant 0 : index
    %19 = vector.load %arg7[%c0_13, %c0_14] : memref<384x128xbf16, #tpu.memory_space<vmem>>, vector<384x128xbf16>
    %cst_15 = arith.constant dense<0.000000e+00> : vector<8x128xf32>
    %20 = tpu.matmul %18, %19, %cst_15 {dimension_numbers = #tpu.dot_dimension_numbers<[1], [0], [0], [1], [0, 0, 1, 1], [], []>} : vector<8x384xbf16>, vector<384x128xbf16>, vector<8x128xf32> -> vector<8x128xf32>
    %c0_16 = arith.constant 0 : index
    %c0_17 = arith.constant 0 : index
    %21 = vector.load %arg8[%c0_16, %c0_17] : memref<1x128xf32, #tpu.memory_space<vmem>>, vector<1x128xf32>
    %22 = vector.broadcast %21 : vector<1x128xf32> to vector<8x128xf32>
    %23 = arith.addf %20, %22 : vector<8x128xf32>
    %24 = math.tanh %23 : vector<8x128xf32>
    %25 = vector.broadcast %0 : f32 to vector<8x128xf32>
    %26 = arith.mulf %25, %24 : vector<8x128xf32>
    %27 = arith.truncf %26 : vector<8x128xf32> to vector<8x128xbf16>
    %c0_18 = arith.constant 0 : index
    %c0_19 = arith.constant 0 : index
    %28 = vector.load %arg9[%c0_18, %c0_19] : memref<8x128xbf16, #tpu.memory_space<vmem>>, vector<8x128xbf16>
    tpu.vector_store %arg9[%c0_18, %c0_19], %27 {strides = array<i32>} : memref<8x128xbf16, #tpu.memory_space<vmem>>, vector<8x128xbf16>,
    return
  }
  func.func @transform_0(%arg0: i32) -> i32 {
    %c0_i32 = arith.constant 0 : i32
    %c0_i32_0 = arith.constant 0 : i32
    return %c0_i32 : i32
  }
  func.func @transform_1(%arg0: i32) -> (i32, i32) {
    %c0_i32 = arith.constant 0 : i32
    %c0_i32_0 = arith.constant 0 : i32
    return %arg0, %c0_i32 : i32, i32
  }
  func.func @transform_2(%arg0: i32) -> (i32, i32) {
    %c0_i32 = arith.constant 0 : i32
    %c0_i32_0 = arith.constant 0 : i32
    %c0_i32_1 = arith.constant 0 : i32
    return %c0_i32, %c0_i32_0 : i32, i32
  }
  func.func @transform_3(%arg0: i32) -> (i32, i32) {
    %c0_i32 = arith.constant 0 : i32
    %c0_i32_0 = arith.constant 0 : i32
    %c0_i32_1 = arith.constant 0 : i32
    return %c0_i32, %c0_i32_0 : i32, i32
  }
  func.func @transform_4(%arg0: i32) -> (i32, i32) {
    %c0_i32 = arith.constant 0 : i32
    %c0_i32_0 = arith.constant 0 : i32
    %c0_i32_1 = arith.constant 0 : i32
    return %c0_i32, %c0_i32_0 : i32, i32
  }
  func.func @transform_5(%arg0: i32) -> (i32, i32) {
    %c0_i32 = arith.constant 0 : i32
    %c0_i32_0 = arith.constant 0 : i32
    %c0_i32_1 = arith.constant 0 : i32
    return %c0_i32, %c0_i32_0 : i32, i32
  }
  func.func @transform_6(%arg0: i32) -> (i32, i32) {
    %c0_i32 = arith.constant 0 : i32
    %c0_i32_0 = arith.constant 0 : i32
    %c0_i32_1 = arith.constant 0 : i32
    return %c0_i32, %c0_i32_0 : i32, i32
  }
  func.func @transform_7(%arg0: i32) -> (i32, i32) {
    %c0_i32 = arith.constant 0 : i32
    %c0_i32_0 = arith.constant 0 : i32
    %c0_i32_1 = arith.constant 0 : i32
    return %c0_i32, %c0_i32_0 : i32, i32
  }
  func.func @transform_8(%arg0: i32) -> (i32, i32) {
    %c0_i32 = arith.constant 0 : i32
    %c0_i32_0 = arith.constant 0 : i32
    return %arg0, %c0_i32 : i32, i32
  }
}

</mosaic_0001>

<bundles_post_ra>
// kernel: tpu_custom_call.1
= control target key start
LH: loop header
LB: loop body
LE: loop exit
PB: predicated region body
PF: predicated region fallthrough
CT: control target
= control target key end

     0   :  { %14 = vsyncpa [#allocation4], 0  ;;  %s2032_s0 = inlined_call_operand.<no memory space> [shape: f32[1], index: 0, kind: input, shape index: {}]   ;;  %s2033_s1 = inlined_call_operand.hbm [shape: f32[8,16], index: 1, kind: input, shape index: {}]   ;;  %s2034_s2 = inlined_call_operand.hbm [shape: bf16[16,512], index: 2, kind: input, shape index: {}]   ;;  %s2035_s3 = inlined_call_operand.vmem [shape: f32[1,512], index: 3, kind: input, shape index: {}]   ;;  %s2036_s4 = inlined_call_operand.hbm [shape: bf16[512,384], index: 4, kind: input, shape index: {}]   ;;  %s2037_s5 = inlined_call_operand.vmem [shape: f32[1,384], index: 5, kind: input, shape index: {}]   ;;  %s2038_s6 = inlined_call_operand.hbm [shape: bf16[384,128], index: 6, kind: input, shape index: {}]   ;;  %s2039_s7 = inlined_call_operand.vmem [shape: f32[1,128], index: 7, kind: input, shape index: {}]   ;;  %s2040_s8 = inlined_call_operand.hbm [shape: bf16[8,128], index: 8, kind: output, shape index: {}]  }
   0x1   :  { %15 = vsyncpa [#allocation7], 0 }
   0x2   :  { %16 = vsyncpa [#allocation10], 0 }
   0x3   :  { %17 = vsyncpa [#allocation5], 0  ;;  %s1874_s27 = smov [#allocation6]   ;;  %s1756_s9 = scalar_lea.hbm %s2034_s2, 512 }
   0x4   :  { %s35_s28 = sshll.u32 %s1874_s27, 4  ;;  %p1757_p0 = scmp.ne.s32.totalorder %s2034_s2, %s1756_s9  ;;  %s36_s28 = int_to_ptr.vmem [resolvable:$true] %s35_s28 }
   0x5   :  { %p1760_p1 = scmp.lt.u32.totalorder %s1756_s9, %s2034_s2 }
   0x7   :  { %p1762_p2 = pnand %p1760_p1, %p1757_p0 }
   0x9   :  { %1765 = shalt.err (!%p1762_p2)
}
   0xa   :  { %s1766_s14 = scalar_lea.vmem %s36_s28, 512  ;;  %p1771_p4 = scmp.lt.s32.totalorder %s36_s28, %s36_s28 }
   0xb   :  { %p1767_p3 = scmp.ne.s32.totalorder %s36_s28, %s1766_s14  ;;  %p1772_p5 = scmp.lt.s32.totalorder %s1766_s14, %s1766_s14 }
   0xd   :  { %p1773_p6 = por %p1772_p5, %p1771_p4 }
   0xf   :  { %p1774_p7 = pnand %p1773_p6, %p1767_p3 }
  0x11   :  { %1777 = shalt.err (!%p1774_p7)
}
  0x12   :  { %s1875_s15 = smov 256   ;;  %s1876_s16 = smov 16  }
  0x13   :  { %41 = dma.hbm_to_vmem [thread:$0]  %s2034_s2, 512, %s36_s28, [#allocation7], %s1875_s15, %s1875_s15, %s1876_s16  }
  0x14   :  { %s1877_s19 = smov [#allocation3]   ;;  %s1878_s21 = smov [#allocation8]  }
  0x15   :  { %s26_s20 = sshll.u32 %s1877_s19, 4  ;;  %s49_s22 = sshll.u32 %s1878_s21, 4  ;;  %s27_s20 = int_to_ptr.vmem [resolvable:$true] %s26_s20  ;;  %s50_s22 = int_to_ptr.vmem [resolvable:$true] %s49_s22 }
  0x16   :  { %s1778_s25 = scalar_lea.hbm %s2033_s1, 128 }
  0x17   :  { %p1779_p8 = scmp.ne.s32.totalorder %s2033_s1, %s1778_s25  ;;  %p1782_p9 = scmp.lt.u32.totalorder %s1778_s25, %s2033_s1 }
  0x19   :  { %p1784_p10 = pnand %p1782_p9, %p1779_p8 }
  0x1b   :  { %1787 = shalt.err (!%p1784_p10)
}
  0x1c   :  { %s1788_s2 = scalar_lea.vmem %s27_s20, 128  ;;  %p1793_p12 = scmp.lt.s32.totalorder %s27_s20, %s27_s20 }
  0x1d   :  { %p1789_p11 = scmp.ne.s32.totalorder %s27_s20, %s1788_s2  ;;  %p1794_p13 = scmp.lt.s32.totalorder %s1788_s2, %s1788_s2 }
  0x1f   :  { %p1795_p0 = por %p1794_p13, %p1793_p12 }
  0x21   :  { %p1796_p1 = pnand %p1795_p0, %p1789_p11 }
  0x23   :  { %1799 = shalt.err (!%p1796_p1)
}
  0x24   :  { %29 = dma.hbm_to_vmem [thread:$0]  %s2033_s1, 128, %s27_s20, [#allocation4]  }
  0x25   :  { %s1800_s12 = scalar_lea.hbm %s2036_s4, 12288 }
  0x26   :  { %p1801_p2 = scmp.ne.s32.totalorder %s2036_s4, %s1800_s12  ;;  %p1804_p3 = scmp.lt.u32.totalorder %s1800_s12, %s2036_s4 }
  0x28   :  { %p1806_p4 = pnand %p1804_p3, %p1801_p2 }
  0x2a   :  { %1809 = shalt.err (!%p1806_p4)
}
  0x2b   :  { %s1810_s17 = scalar_lea.vmem %s50_s22, 12288  ;;  %p1815_p6 = scmp.lt.s32.totalorder %s50_s22, %s50_s22 }
  0x2c   :  { %p1811_p5 = scmp.ne.s32.totalorder %s50_s22, %s1810_s17  ;;  %p1816_p7 = scmp.lt.s32.totalorder %s1810_s17, %s1810_s17 }
  0x2e   :  { %p1817_p8 = por %p1816_p7, %p1815_p6 }
  0x30   :  { %p1818_p9 = pnand %p1817_p8, %p1811_p5 }
  0x32   :  { %1821 = shalt.err (!%p1818_p9)
}
  0x33   :  { %s1879_s1 = smov 192   ;;  %s1880_s18 = smov 12  }
  0x34   :  { %55 = dma.hbm_to_vmem [thread:$0]  %s2036_s4, 12288, %s50_s22, [#allocation7], %s1879_s1, %s1879_s1, %s1880_s18  }
  0x35   :  { %s1881_s21 = smov [#allocation9]   ;;  %s1822_s26 = scalar_lea.hbm %s2038_s6, 3072 }
  0x36   :  { %s63_s23 = sshll.u32 %s1881_s21, 4  ;;  %p1823_p10 = scmp.ne.s32.totalorder %s2038_s6, %s1822_s26  ;;  %s64_s23 = int_to_ptr.vmem [resolvable:$true] %s63_s23 }
  0x37   :  { %p1826_p11 = scmp.lt.u32.totalorder %s1822_s26, %s2038_s6 }
  0x39   :  { %p1828_p12 = pnand %p1826_p11, %p1823_p10 }
  0x3b   :  { %1831 = shalt.err (!%p1828_p12)
}
  0x3c   :  { %s1832_s28 = scalar_lea.vmem %s64_s23, 3072  ;;  %p1837_p0 = scmp.lt.s32.totalorder %s64_s23, %s64_s23 }
  0x3d   :  { %p1833_p13 = scmp.ne.s32.totalorder %s64_s23, %s1832_s28  ;;  %p1838_p1 = scmp.lt.s32.totalorder %s1832_s28, %s1832_s28 }
  0x3f   :  { %p1839_p2 = por %p1838_p1, %p1837_p0 }
  0x41   :  { %p1840_p3 = pnand %p1839_p2, %p1833_p13 }
  0x43   :  { %1843 = shalt.err (!%p1840_p3)
}
  0x44   :  { %s1882_s4 = smov 64   ;;  %s1883_s22 = smov 4  }
  0x45   :  { %69 = dma.hbm_to_vmem [thread:$0]  %s2038_s6, 3072, %s64_s23, [#allocation10], %s1882_s4, %s1882_s4, %s1883_s22  }
  0x46   :  { %1866 = dma.done.wait [#allocation4], 128  }
  0x47   :  { %1867 = vsyncadd [#allocation4], 4294967168 }
  0x48   :  { %1868 = dma.done.wait [#allocation7], 12800  }
  0x49   :  { %1869 = vsyncadd [#allocation7], 4294954496 }
  0x4a   :  { %1870 = dma.done.wait [#allocation10], 3072  }
  0x4b   :  { %1871 = vsyncadd [#allocation10], 4294964224  ;;  %v1884_v0 = vmov 0   ;;  %v1596_v1 = vld [vmem:[#allocation6 + $0x4] ss:$16 sps:$4 sm:$0xff]   ;;  %v86_v3 = vld [vmem:[#allocation3] sm:$0xff]  ;;  %v94_v57 = vlaneseq }
  0x4c   :  { %170 = vmatprep.mubr.bf16.mxu0 %v1884_v0  ;;  %211 = vmatprep.mubr.bf16.mxu1 %v1884_v0  ;;  %v1598_v2 = vld [vmem:[#allocation6] ss:$16 sps:$4 sm:$0xff]   ;;  %v87_v4 = vpack.c.bf16 %v86_v3, %v86_v3  ;;  %v1599_v5 = vld [vmem:[#allocation6 + $0xc] ss:$16 sps:$4 sm:$0xff]   ;;  %v1601_v6 = vld [vmem:[#allocation6 + $0x8] ss:$16 sps:$4 sm:$0xff]  }
  0x4d   :  { %138 = vmatprep.subr.bf16.mxu0 %v1596_v1  ;;  %vm134_vm0 = vcmask 130048   ;;  %v1602_v7 = vld [vmem:[#allocation8] ss:$12 sps:$4 sm:$0xff]   ;;  %179 = vmatprep.subr.bf16.mxu1 %v1599_v5  ;;  %v1604_v8 = vld [vmem:[#allocation8 + $0x4] ss:$12 sps:$4 sm:$0xff]   ;;  %v1981_v58 = vshrl.u32 %v94_v57, 7 }
  0x4e   :  { %139 = vmatpush1.bf16.msra.mxu0 %v1598_v2  ;;  %180 = vmatpush1.bf16.msra.mxu1 %v1601_v6  ;;  %v1607_v9 = vld [vmem:[#allocation8 + $0x1c] ss:$12 sps:$4 sm:$0xff]   ;;  %v1605_v10 = vld [vmem:[#allocation8 + $0x18] ss:$12 sps:$4 sm:$0xff]   ;;  %v1610_v11 = vld [vmem:[#allocation8 + $0x34] ss:$12 sps:$4 sm:$0xff]  }
  0x4f   :  { %885 = vmatprep.subr.bf16.mxu0 %v1604_v8  ;;  %v1608_v12 = vld [vmem:[#allocation8 + $0x30] ss:$12 sps:$4 sm:$0xff]   ;;  %v1613_v13 = vld [vmem:[#allocation8 + $0x4c] ss:$12 sps:$4 sm:$0xff]   ;;  %v1611_v14 = vld [vmem:[#allocation8 + $0x48] ss:$12 sps:$4 sm:$0xff]  }
  0x50   :  { %v1616_v15 = vld [vmem:[#allocation8 + $0x64] ss:$12 sps:$4 sm:$0xff]   ;;  %v1629_v16 = vld [vmem:[#allocation8 + $0xc8] ss:$12 sps:$4 sm:$0xff]   ;;  %v1614_v18 = vld [vmem:[#allocation8 + $0x60] ss:$12 sps:$4 sm:$0xff]  }
  0x51   :  { %1358 = vmatmul.mubr.msk.bf16.vlgmr.msra.gmra.mrb[0].mxu0 %vm134_vm0, %v87_v4  ;;  %1359 = vmatmul.mubr.msk.bf16.vlgmr.msra.gmra.mrb[0].mxu1 %vm134_vm0, %v87_v4  ;;  %v1630_v17 = vld [vmem:[#allocation8 + $0x8] ss:$12 sps:$4 sm:$0xff]   ;;  %v1634_v20 = vld [vmem:[#allocation8 + $0xe0] ss:$12 sps:$4 sm:$0xff]   ;;  %v1617_v22 = vld [vmem:[#allocation8 + $0x78] ss:$12 sps:$4 sm:$0xff]  }
  0x52   :  { %886 = vmatpush1.bf16.msra.mxu0 %v1602_v7  ;;  %1481 = vmatprep.subr.bf16.mxu1 %v1629_v16  ;;  %v1619_v19 = vld [vmem:[#allocation8 + $0x7c] ss:$12 sps:$4 sm:$0xff]   ;;  %v1635_v21 = vld [vmem:[#allocation8 + $0x20] ss:$12 sps:$4 sm:$0xff]   ;;  %v1639_v23 = vld [vmem:[#allocation8 + $0xf8] ss:$12 sps:$4 sm:$0xff]  }
  0x53   :  { %887 = vmatprep.subr.bf16.mxu0 %v1607_v9  ;;  %1482 = vmatpush3.bf16.msra.mxu1 %v1630_v17  ;;  %v1640_v24 = vld [vmem:[#allocation8 + $0x38] ss:$12 sps:$4 sm:$0xff]   ;;  %v1622_v25 = vld [vmem:[#allocation8 + $0x94] ss:$12 sps:$4 sm:$0xff]   ;;  %v1644_v26 = vld [vmem:[#allocation8 + $0x110] ss:$12 sps:$4 sm:$0xff]  }
  0x54   :  { %1483 = vmatprep.subr.bf16.mxu1 %v1634_v20  ;;  %v1645_v27 = vld [vmem:[#allocation8 + $0x50] ss:$12 sps:$4 sm:$0xff]   ;;  %v1625_v29 = vld [vmem:[#allocation8 + $0xac] ss:$12 sps:$4 sm:$0xff]   ;;  %v1649_v30 = vld [vmem:[#allocation8 + $0x128] ss:$12 sps:$4 sm:$0xff]  }
  0x55   :  { %v1620_v28 = vld [vmem:[#allocation8 + $0x90] ss:$12 sps:$4 sm:$0xff]   ;;  %v1650_v31 = vld [vmem:[#allocation8 + $0x68] ss:$12 sps:$4 sm:$0xff]   ;;  %v1654_v34 = vld [vmem:[#allocation8 + $0x140] ss:$12 sps:$4 sm:$0xff]  }
  0x56   :  { %888 = vmatpush1.bf16.msra.mxu0 %v1605_v10  ;;  %v1623_v32 = vld [vmem:[#allocation8 + $0xa8] ss:$12 sps:$4 sm:$0xff]   ;;  %v1628_v33 = vld [vmem:[#allocation8 + $0xc4] ss:$12 sps:$4 sm:$0xff]   ;;  %v1626_v35 = vld [vmem:[#allocation8 + $0xc0] ss:$12 sps:$4 sm:$0xff]  }
  0x57   :  { %889 = vmatprep.subr.bf16.mxu0 %v1610_v11  ;;  %1484 = vmatpush3.bf16.msra.mxu1 %v1635_v21  ;;  %v1655_v36 = vld [vmem:[#allocation8 + $0x80] ss:$12 sps:$4 sm:$0xff]   ;;  %v1633_v37 = vld [vmem:[#allocation8 + $0xdc] ss:$12 sps:$4 sm:$0xff]   ;;  %v1631_v38 = vld [vmem:[#allocation8 + $0xd8] ss:$12 sps:$4 sm:$0xff]  }
  0x58   :  { %1485 = vmatprep.subr.bf16.mxu1 %v1639_v23  ;;  %v1638_v39 = vld [vmem:[#allocation8 + $0xf4] ss:$12 sps:$4 sm:$0xff]   ;;  %v1636_v40 = vld [vmem:[#allocation8 + $0xf0] ss:$12 sps:$4 sm:$0xff]   ;;  %v1643_v41 = vld [vmem:[#allocation8 + $0x10c] ss:$12 sps:$4 sm:$0xff]  }
  0x59   :  { %v1641_v42 = vld [vmem:[#allocation8 + $0x108] ss:$12 sps:$4 sm:$0xff]   ;;  %v1648_v43 = vld [vmem:[#allocation8 + $0x124] ss:$12 sps:$4 sm:$0xff]   ;;  %v1646_v44 = vld [vmem:[#allocation8 + $0x120] ss:$12 sps:$4 sm:$0xff]  }
  0x5a   :  { %890 = vmatpush1.bf16.msra.mxu0 %v1608_v12  ;;  %v1653_v45 = vld [vmem:[#allocation8 + $0x13c] ss:$12 sps:$4 sm:$0xff]   ;;  %v1651_v46 = vld [vmem:[#allocation8 + $0x138] ss:$12 sps:$4 sm:$0xff]   ;;  %v1658_v47 = vld [vmem:[#allocation8 + $0x154] ss:$12 sps:$4 sm:$0xff]  }
  0x5b   :  { %891 = vmatprep.subr.bf16.mxu0 %v1613_v13  ;;  %1486 = vmatpush3.bf16.msra.mxu1 %v1640_v24  ;;  %v1659_v48 = vld [vmem:[#allocation8 + $0x158] ss:$12 sps:$4 sm:$0xff]   ;;  %v1656_v49 = vld [vmem:[#allocation8 + $0x150] ss:$12 sps:$4 sm:$0xff]   ;;  %v1661_v53 = vld [vmem:[#allocation8 + $0x168] ss:$12 sps:$4 sm:$0xff]  }
  0x5c   :  { %1487 = vmatprep.subr.bf16.mxu1 %v1644_v26  ;;  %v1660_v50 = vld [vmem:[#allocation8 + $0x98] ss:$12 sps:$4 sm:$0xff]   ;;  %v1664_v52 = vld [vmem:[#allocation8 + $0x170] ss:$12 sps:$4 sm:$0xff]   ;;  %v1669_v56 = vld [vmem:[#allocation8 + $0x248] ss:$12 sps:$4 sm:$0xff]  }
  0x5d   :  { %v1663_v51 = vld [vmem:[#allocation8 + $0x16c] ss:$12 sps:$4 sm:$0xff]   ;;  %v1665_v54 = vld [vmem:[#allocation8 + $0xb0] ss:$12 sps:$4 sm:$0xff]   ;;  %v96_v59 = vsub.s32 0, %v1981_v58  ;;  %v100_v61 = vsub.s32 1, %v1981_v58 }
  0x5e   :  { %892 = vmatpush1.bf16.msra.mxu0 %v1611_v14  ;;  %v1668_v55 = vld [vmem:[#allocation8 + $0x184] ss:$12 sps:$4 sm:$0xff]   ;;  %v1987_v60 = vld [vmem:[%s2035_s3] sm:$0xf]  ;;  %v108_v62 = vsub.s32 3, %v1981_v58  ;;  %vm1886_vm1 = vmmov 0  }
  0x5f   :  { %893 = vmatprep.subr.bf16.mxu0 %v1616_v15  ;;  %1488 = vmatpush3.bf16.msra.mxu1 %v1645_v27  ;;  %v97_v63 = vrot.slane %v1987_v60, %v96_v59  ;;  %v101_v0 = vrot.slane %v1987_v60, %v100_v61  ;;  %v1666_v16 = vld [vmem:[#allocation8 + $0x180] ss:$12 sps:$4 sm:$0xff]   ;;  %v1670_v17 = vld [vmem:[#allocation8 + $0x188] ss:$12 sps:$4 sm:$0xff]   ;;  %v1671_v23 = vld [vmem:[#allocation8 + $0x198] ss:$12 sps:$4 sm:$0xff]  }
  0x60   :  { %1489 = vmatprep.subr.bf16.mxu1 %v1649_v30  ;;  %v109_v2 = vrot.slane %v1987_v60, %v108_v62  ;;  %v1673_v20 = vld [vmem:[#allocation8 + $0x19c] ss:$12 sps:$4 sm:$0xff]   ;;  %v1674_v21 = vld [vmem:[#allocation8 + $0x260] ss:$12 sps:$4 sm:$0xff]   ;;  %v1679_v26 = vld [vmem:[#allocation8 + $0x278] ss:$12 sps:$4 sm:$0xff]  }
  0x61   :  { %v1675_v24 = vld [vmem:[#allocation8 + $0x1a0] ss:$12 sps:$4 sm:$0xff]   ;;  %v1676_v27 = vld [vmem:[#allocation8 + $0x1b0] ss:$12 sps:$4 sm:$0xff]   ;;  %v1709_v57 = vld [vmem:[#allocation8 + $0x258] ss:$12 sps:$4 sm:$0xff]  }
  0x62   :  { %894 = vmatpush1.bf16.msra.mxu0 %v1614_v18  ;;  %v1684_v30 = vld [vmem:[#allocation8 + $0x290] ss:$12 sps:$4 sm:$0xff]   ;;  %s1887_s16 = smov [#allocation11]  }
  0x63   :  { %895 = vmatprep.subr.bf16.mxu0 %v1619_v19  ;;  %1490 = vmatpush3.bf16.msra.mxu1 %v1650_v31  ;;  %v1681_v31 = vld [vmem:[#allocation8 + $0x1c8] ss:$12 sps:$4 sm:$0xff]   ;;  %v1712_v62 = vld [vmem:[#allocation8 + $0x270] ss:$12 sps:$4 sm:$0xff]   ;;  %s1343_s17 = sshll.u32 %s1887_s16, 4  ;;  %s1344_s17 = int_to_ptr.vmem [resolvable:$true] %s1343_s17 }
  0x64   :  { %1491 = vmatprep.subr.bf16.mxu1 %v1654_v34  ;;  %v1689_v34 = vld [vmem:[#allocation8 + $0x2a8] ss:$12 sps:$4 sm:$0xff]   ;;  %s1844_s1 = scalar_lea.vmem %s1344_s17, 64  ;;  %p1849_p5 = scmp.lt.s32.totalorder %s1344_s17, %s1344_s17 }
  0x65   :  { %p1845_p4 = scmp.ne.s32.totalorder %s1344_s17, %s1844_s1  ;;  %p1850_p6 = scmp.lt.s32.totalorder %s1844_s1, %s1844_s1 }
  0x66   :  { %896 = vmatpush1.bf16.msra.mxu0 %v1617_v22 }
  0x67   :  { %897 = vmatprep.subr.bf16.mxu0 %v1622_v25  ;;  %1492 = vmatpush3.bf16.msra.mxu1 %v1655_v36  ;;  %v1678_v25 = vld [vmem:[#allocation8 + $0x1b4] ss:$12 sps:$4 sm:$0xff]   ;;  %p1851_p7 = por %p1850_p6, %p1849_p5 }
  0x68   :  { %1493 = vmatprep.subr.bf16.mxu1 %v1659_v48  ;;  %v1686_v36 = vld [vmem:[#allocation8 + $0x1e0] ss:$12 sps:$4 sm:$0xff]  }
  0x69   :  { %v1703_v48 = vld [vmem:[#allocation8 + $0x22c] ss:$12 sps:$4 sm:$0xff]   ;;  %p1852_p8 = pnand %p1851_p7, %p1845_p4 }
  0x6a   :  { %898 = vmatpush1.bf16.msra.mxu0 %v1620_v28  ;;  %v1680_v28 = vld [vmem:[#allocation8 + $0x1b8] ss:$12 sps:$4 sm:$0xff]  }
  0x6b   :  { %899 = vmatprep.subr.bf16.mxu0 %v1625_v29  ;;  %1494 = vmatpush3.bf16.msra.mxu1 %v1660_v50  ;;  %v1683_v29 = vld [vmem:[#allocation8 + $0x1cc] ss:$12 sps:$4 sm:$0xff]  }
  0x6c   :  { %1495 = vmatprep.subr.bf16.mxu1 %v1664_v52  ;;  %v1705_v52 = vld [vmem:[#allocation8 + $0x230] ss:$12 sps:$4 sm:$0xff]  }
  0x6e   :  { %900 = vmatpush1.bf16.msra.mxu0 %v1623_v32  ;;  %v1685_v32 = vld [vmem:[#allocation8 + $0x1d0] ss:$12 sps:$4 sm:$0xff]  }
  0x6f   :  { %901 = vmatprep.subr.bf16.mxu0 %v1628_v33  ;;  %1496 = vmatpush3.bf16.msra.mxu1 %v1665_v54  ;;  %v1688_v33 = vld [vmem:[#allocation8 + $0x1e4] ss:$12 sps:$4 sm:$0xff]  }
  0x70   :  { %1503 = vmatprep.subr.bf16.mxu1 %v1669_v56  ;;  %v1711_v56 = vld [vmem:[#allocation8 + $0x25c] ss:$12 sps:$4 sm:$0xff]  }
  0x72   :  { %902 = vmatpush1.bf16.msra.mxu0 %v1626_v35  ;;  %v104_v35 = vsub.s32 2, %v1981_v58  ;;  %v1748_v58 = vld [vmem:[#allocation9 + $0x90] sm:$0xff]  }
  0x73   :  { %903 = vmatprep.subr.bf16.mxu0 %v1633_v37  ;;  %v1690_v37 = vld [vmem:[#allocation8 + $0x1e8] ss:$12 sps:$4 sm:$0xff]  }
  0x76   :  { %904 = vmatpush1.bf16.msra.mxu0 %v1631_v38  ;;  %v1693_v38 = vld [vmem:[#allocation8 + $0x1fc] ss:$12 sps:$4 sm:$0xff]  }
  0x77   :  { %905 = vmatprep.subr.bf16.mxu0 %v1638_v39  ;;  %v1694_v39 = vld [vmem:[#allocation8 + $0x2c0] ss:$12 sps:$4 sm:$0xff]  }
  0x7a   :  { %906 = vmatpush1.bf16.msra.mxu0 %v1636_v40  ;;  %v105_v40 = vrot.slane %v1987_v60, %v104_v35  ;;  %v1714_v60 = vld [vmem:[#allocation8 + $0x274] ss:$12 sps:$4 sm:$0xff]  }
  0x7b   :  { %907 = vmatprep.subr.bf16.mxu0 %v1643_v41  ;;  %v1691_v41 = vld [vmem:[#allocation8 + $0x1f8] ss:$12 sps:$4 sm:$0xff]  }
  0x7e   :  { %908 = vmatpush1.bf16.msra.mxu0 %v1641_v42  ;;  %v1695_v42 = vld [vmem:[#allocation8 + $0x200] ss:$12 sps:$4 sm:$0xff]  }
  0x7f   :  { %909 = vmatprep.subr.bf16.mxu0 %v1648_v43  ;;  %v1698_v43 = vld [vmem:[#allocation8 + $0x214] ss:$12 sps:$4 sm:$0xff]  }
  0x82   :  { %910 = vmatpush1.bf16.msra.mxu0 %v1646_v44  ;;  %v1699_v44 = vld [vmem:[#allocation8 + $0x2d8] ss:$12 sps:$4 sm:$0xff]  }
  0x83   :  { %911 = vmatprep.subr.bf16.mxu0 %v1653_v45 }
  0x86   :  { %912 = vmatpush1.bf16.msra.mxu0 %v1651_v46  ;;  %v1696_v46 = vld [vmem:[#allocation8 + $0x210] ss:$12 sps:$4 sm:$0xff]  }
  0x87   :  { %913 = vmatprep.subr.bf16.mxu0 %v1658_v47  ;;  %v1700_v47 = vld [vmem:[#allocation8 + $0x218] ss:$12 sps:$4 sm:$0xff]  }
  0x8a   :  { %914 = vmatpush1.bf16.msra.mxu0 %v1656_v49  ;;  %v1704_v49 = vld [vmem:[#allocation8 + $0x2f0] ss:$12 sps:$4 sm:$0xff]  }
  0x8b   :  { %915 = vmatprep.subr.bf16.mxu0 %v1663_v51  ;;  %v1701_v51 = vld [vmem:[#allocation8 + $0x228] ss:$12 sps:$4 sm:$0xff]  }
  0x8e   :  { %916 = vmatpush1.bf16.msra.mxu0 %v1661_v53  ;;  %v1708_v53 = vld [vmem:[#allocation8 + $0x244] ss:$12 sps:$4 sm:$0xff]  }
  0x8f   :  { %926 = vmatprep.subr.bf16.mxu0 %v1668_v55  ;;  %v1706_v55 = vld [vmem:[#allocation8 + $0x240] ss:$12 sps:$4 sm:$0xff]  }
 0x124   :  { %v172_v1 = vpop.f32.mrb[0].mxu0  ;;  %v1998_v7 = vpop.f32.mrb[0].mxu1 }
 0x125   :  { %v173_v3 = vadd.f32 %v172_v1, %v97_v63  ;;  %v174_v4 = vpop.f32.mrb[1].mxu0  ;;  %v215_v10 = vpop.f32.mrb[1].mxu1  ;;  %v214_v45 = vadd.f32 %v1998_v7, %v105_v40  ;;  %v1717_v63 = vld [vmem:[#allocation8 + $0x28c] ss:$12 sps:$4 sm:$0xff]   ;;  %v1720_v1 = vld [vmem:[#allocation8 + $0x2a4] ss:$12 sps:$4 sm:$0xff]  }
 0x126   :  { %v175_v5 = vadd.f32 %v174_v4, %v101_v0  ;;  %v176_v6 = vpop.f32.mrb[2].mxu0  ;;  %v216_v12 = vadd.f32 %v215_v10, %v109_v2  ;;  %v217_v13 = vpop.f32.mrb[2].mxu1  ;;  %v1715_v0 = vld [vmem:[#allocation8 + $0x288] ss:$12 sps:$4 sm:$0xff]   ;;  %v1718_v2 = vld [vmem:[#allocation8 + $0x2a0] ss:$12 sps:$4 sm:$0xff]  }
 0x127   :  { %v220_v8 = vmax.f32 %v173_v3, 0.0  ;;  %v177_v9 = vpop.f32.mrb[3].mxu0  ;;  %v218_v14 = vpop.f32.mrb[3].mxu1  ;;  %v222_v50 = vmax.f32 %v214_v45, 0.0  ;;  %v1723_v3 = vld [vmem:[#allocation8 + $0x2bc] ss:$12 sps:$4 sm:$0xff]  }
 0x128   :  { %v221_v11 = vmax.f32 %v175_v5, 0.0  ;;  %v223_v18 = vmax.f32 %v216_v12, 0.0  ;;  %v1721_v4 = vld [vmem:[#allocation8 + $0x2b8] ss:$12 sps:$4 sm:$0xff]   ;;  %v1726_v5 = vld [vmem:[#allocation8 + $0x2d4] ss:$12 sps:$4 sm:$0xff]  }
 0x129   :  { %v224_v19 = vpack.c.bf16 %v220_v8, %v220_v8  ;;  %v226_v54 = vpack.c.bf16 %v222_v50, %v222_v50  ;;  %v1724_v6 = vld [vmem:[#allocation8 + $0x2d0] ss:$12 sps:$4 sm:$0xff]   ;;  %v1729_v7 = vld [vmem:[#allocation8 + $0x2ec] ss:$12 sps:$4 sm:$0xff]   ;;  %v1727_v8 = vld [vmem:[#allocation8 + $0x2e8] ss:$12 sps:$4 sm:$0xff]  }
 0x12a   :  { %v225_v15 = vpack.c.bf16 %v221_v11, %v221_v11  ;;  %v227_v22 = vpack.c.bf16 %v223_v18, %v223_v18  ;;  %v1730_v9 = vld [vmem:[#allocation9 + $0x40] sm:$0xff]   ;;  %v1732_v11 = vld [vmem:[#allocation9 + $0x48] sm:$0xff]   ;;  %v1734_v13 = vld [vmem:[#allocation9 + $0x50] sm:$0xff]  }
 0x12b   :  { %v1731_v10 = vld [vmem:[#allocation9] sm:$0xff]   ;;  %v1733_v12 = vld [vmem:[#allocation9 + $0x8] sm:$0xff]   ;;  %v1735_v14 = vld [vmem:[#allocation9 + $0x10] sm:$0xff]  }
 0x12c   :  { %917 = vmatprep.mubr.bf16.mxu0 %v225_v15  ;;  %999 = vmatprep.mubr.bf16.mxu1 %v225_v15  ;;  %v1736_v15 = vld [vmem:[#allocation9 + $0x58] sm:$0xff]   ;;  %v1739_v18 = vld [vmem:[#allocation9 + $0x20] sm:$0xff]  }
 0x12d   :  { %918 = vmatmul.mubr.bf16.vlgmr.msra.gmra.mrb[4].mxu0 %v224_v19  ;;  %1000 = vmatmul.mubr.bf16.vlgmr.msra.gmra.mrb[4].mxu1 %v224_v19  ;;  %v1740_v19 = vld [vmem:[#allocation9 + $0x68] sm:$0xff]  }
 0x12e   :  { %927 = vmatpush1.bf16.msra.mxu0 %v1666_v16  ;;  %1504 = vmatpush3.bf16.msra.mxu1 %v1670_v17  ;;  %v1737_v16 = vld [vmem:[#allocation9 + $0x18] sm:$0xff]   ;;  %v1738_v17 = vld [vmem:[#allocation9 + $0x60] sm:$0xff]  }
 0x12f   :  { %928 = vmatprep.subr.bf16.mxu0 %v1673_v20  ;;  %1505 = vmatprep.subr.bf16.mxu1 %v1674_v21  ;;  %v1741_v20 = vld [vmem:[#allocation9 + $0x28] sm:$0xff]   ;;  %v1742_v21 = vld [vmem:[#allocation9 + $0x70] sm:$0xff]  }
 0x130   :  { %1039 = vmatprep.mubr.bf16.mxu1 %v227_v22  ;;  %958 = vmatprep.mubr.bf16.mxu0 %v227_v22  ;;  %v1743_v22 = vld [vmem:[#allocation9 + $0x30] sm:$0xff]  }
 0x132   :  { %929 = vmatpush1.bf16.msra.mxu0 %v1671_v23  ;;  %1506 = vmatpush3.bf16.msra.mxu1 %v1675_v24  ;;  %v1744_v23 = vld [vmem:[#allocation9 + $0x78] sm:$0xff]  }
 0x133   :  { %930 = vmatprep.subr.bf16.mxu0 %v1678_v25  ;;  %1507 = vmatprep.subr.bf16.mxu1 %v1679_v26  ;;  %v1745_v24 = vld [vmem:[#allocation9 + $0x38] sm:$0xff]   ;;  %v1885_v25 = vmov 0.0  }
 0x136   :  { %931 = vmatpush1.bf16.msra.mxu0 %v1676_v27  ;;  %1508 = vmatpush3.bf16.msra.mxu1 %v1680_v28 }
 0x137   :  { %932 = vmatprep.subr.bf16.mxu0 %v1683_v29  ;;  %1509 = vmatprep.subr.bf16.mxu1 %v1684_v30 }
 0x13a   :  { %933 = vmatpush1.bf16.msra.mxu0 %v1681_v31  ;;  %1510 = vmatpush3.bf16.msra.mxu1 %v1685_v32  ;;  %v356_v31 = vld [vmem:[%s2037_s5] sm:$0x7] }
 0x13b   :  { %934 = vmatprep.subr.bf16.mxu0 %v1688_v33  ;;  %1511 = vmatprep.subr.bf16.mxu1 %v1689_v34  ;;  %v369_v32 = vrot.slane %v356_v31, %v104_v35 }
 0x13e   :  { %935 = vmatpush1.bf16.msra.mxu0 %v1686_v36  ;;  %1512 = vmatpush3.bf16.msra.mxu1 %v1690_v37 }
 0x13f   :  { %936 = vmatprep.subr.bf16.mxu0 %v1693_v38  ;;  %1513 = vmatprep.subr.bf16.mxu1 %v1694_v39 }
 0x142   :  { %937 = vmatpush1.bf16.msra.mxu0 %v1691_v41  ;;  %1514 = vmatpush3.bf16.msra.mxu1 %v1695_v42  ;;  %v361_v41 = vrot.slane %v356_v31, %v96_v59  ;;  %v365_v42 = vrot.slane %v356_v31, %v100_v61  ;;  %v1749_v59 = vld [vmem:[#allocation9 + $0x98] sm:$0xff]   ;;  %v1750_v61 = vld [vmem:[#allocation9 + $0xa0] sm:$0xff]  }
 0x143   :  { %938 = vmatprep.subr.bf16.mxu0 %v1698_v43  ;;  %1515 = vmatprep.subr.bf16.mxu1 %v1699_v44 }
 0x146   :  { %939 = vmatpush1.bf16.msra.mxu0 %v1696_v46  ;;  %1516 = vmatpush3.bf16.msra.mxu1 %v1700_v47 }
 0x147   :  { %940 = vmatprep.subr.bf16.mxu0 %v1703_v48  ;;  %1517 = vmatprep.subr.bf16.mxu1 %v1704_v49 }
 0x14a   :  { %941 = vmatpush1.bf16.msra.mxu0 %v1701_v51  ;;  %1518 = vmatpush3.bf16.msra.mxu1 %v1705_v52  ;;  %v1746_v51 = vld [vmem:[#allocation9 + $0x80] sm:$0xff]  }
 0x14b   :  { %942 = vmatprep.subr.bf16.mxu0 %v1708_v53  ;;  %1525 = vmatprep.subr.bf16.mxu1 %v1730_v9  ;;  %v1747_v53 = vld [vmem:[#allocation9 + $0x88] sm:$0xff]  }
 0x14d   :  { %1040 = vmatmul.mubr.bf16.vlgmr.msra.gmra.mrb[8].mxu1 %v226_v54 }
 0x14e   :  { %943 = vmatpush1.bf16.msra.mxu0 %v1706_v55  ;;  %1526 = vmatpush3.bf16.msra.mxu1 %v1731_v10  ;;  %v1752_v55 = vld [vmem:[#allocation9 + $0xb0] sm:$0xff]   ;;  %v1333_v10 = vstv %s2032_s0 }
 0x14f   :  { %944 = vmatprep.subr.bf16.mxu0 %v1711_v56  ;;  %1527 = vmatprep.subr.bf16.mxu1 %v1732_v11  ;;  %v1753_v56 = vld [vmem:[#allocation9 + $0xb8] sm:$0xff]  }
 0x152   :  { %945 = vmatpush1.bf16.msra.mxu0 %v1709_v57  ;;  %1528 = vmatpush3.bf16.msra.mxu1 %v1733_v12 }
 0x153   :  { %946 = vmatprep.subr.bf16.mxu0 %v1714_v60  ;;  %1529 = vmatprep.subr.bf16.mxu1 %v1734_v13 }
 0x156   :  { %947 = vmatpush1.bf16.msra.mxu0 %v1712_v62  ;;  %1530 = vmatpush3.bf16.msra.mxu1 %v1735_v14 }
 0x157   :  { %948 = vmatprep.subr.bf16.mxu0 %v1717_v63  ;;  %1531 = vmatprep.subr.bf16.mxu1 %v1736_v15 }
 0x15a   :  { %949 = vmatpush1.bf16.msra.mxu0 %v1715_v0  ;;  %1532 = vmatpush3.bf16.msra.mxu1 %v1737_v16 }
 0x15b   :  { %950 = vmatprep.subr.bf16.mxu0 %v1720_v1  ;;  %1533 = vmatprep.subr.bf16.mxu1 %v1738_v17 }
 0x15e   :  { %951 = vmatpush1.bf16.msra.mxu0 %v1718_v2  ;;  %1534 = vmatpush3.bf16.msra.mxu1 %v1739_v18 }
 0x15f   :  { %952 = vmatprep.subr.bf16.mxu0 %v1723_v3  ;;  %1535 = vmatprep.subr.bf16.mxu1 %v1740_v19  ;;  %v1456_v3 = vld [vmem:[%s2039_s7] ss:$0 sm:$0xff] }
 0x162   :  { %953 = vmatpush1.bf16.msra.mxu0 %v1721_v4  ;;  %1536 = vmatpush3.bf16.msra.mxu1 %v1741_v20 }
 0x163   :  { %954 = vmatprep.subr.bf16.mxu0 %v1726_v5  ;;  %1537 = vmatprep.subr.bf16.mxu1 %v1742_v21 }
 0x166   :  { %955 = vmatpush1.bf16.msra.mxu0 %v1724_v6  ;;  %1538 = vmatpush3.bf16.msra.mxu1 %v1743_v22 }
 0x167   :  { %956 = vmatprep.subr.bf16.mxu0 %v1729_v7  ;;  %1539 = vmatprep.subr.bf16.mxu1 %v1744_v23 }
 0x16a   :  { %957 = vmatpush1.bf16.msra.mxu0 %v1727_v8  ;;  %1540 = vmatpush3.bf16.msra.mxu1 %v1745_v24 }
 0x16b   :  { %1556 = vmatprep.subr.bf16.mxu1 %v1885_v25 }
 0x16d   :  { %959 = vmatmul.mubr.bf16.vlgmr.msra.gmra.mrb[4].mxu0 %v226_v54  ;;  %v1751_v54 = vld [vmem:[#allocation9 + $0xa8] sm:$0xff]  }
 0x200   :  { %v1497_v26 = vpop.f32.mrb[4].mxu1 }
 0x201   :  { %v1498_v27 = vpop.f32.mrb[5].mxu1 }
 0x202   :  { %v1499_v28 = vadd.f32 %v1498_v27, %v1497_v26  ;;  %v1500_v29 = vpop.f32.mrb[6].mxu1 }
 0x203   :  { %v1501_v30 = vpop.f32.mrb[7].mxu1 }
 0x204   :  { %v1002_v36 = vadd.f32 %v1499_v28, %v369_v32 }
 0x220   :  { %v1519_v33 = vpop.f32.mrb[8].mxu1 }
 0x221   :  { %v1520_v34 = vpop.f32.mrb[9].mxu1 }
 0x222   :  { %v1521_v37 = vadd.f32 %v1520_v34, %v1519_v33  ;;  %v1522_v38 = vpop.f32.mrb[10].mxu1 }
 0x223   :  { %v1523_v39 = vpop.f32.mrb[11].mxu1 }
 0x224   :  { %v1042_v40 = vadd.f32 %v1521_v37, %v1002_v36 }
 0x226   :  { %v1049_v57 = vmax.f32 %v1042_v40, 0.0 }
 0x228   :  { %v1052_v60 = vpack.c.bf16 %v1049_v57, %v1049_v57 }
 0x240   :  { %v960_v43 = vpop.f32.mrb[4].mxu0 }
 0x241   :  { %v1576_v44 = vadd.f32 %v960_v43, %v361_v41  ;;  %v962_v45 = vpop.f32.mrb[5].mxu0 }
 0x242   :  { %v1577_v46 = vadd.f32 %v962_v45, %v365_v42  ;;  %v964_v47 = vpop.f32.mrb[6].mxu0 }
 0x243   :  { %v1047_v48 = vmax.f32 %v1576_v44, 0.0  ;;  %v965_v35 = vpop.f32.mrb[7].mxu0 }
 0x244   :  { %v1048_v49 = vmax.f32 %v1577_v46, 0.0 }
 0x245   :  { %v1050_v52 = vpack.c.bf16 %v1047_v48, %v1047_v48 }
 0x246   :  { %v1051_v50 = vpack.c.bf16 %v1048_v49, %v1048_v49 }
 0x248   :  { %1284 = vmatprep.mubr.bf16.mxu1 %v1051_v50 }
 0x249   :  { %1285 = vmatmul.mubr.bf16.vlgmr.msra.gmra.mrb[12].mxu1 %v1050_v52 }
 0x24a   :  { %1557 = vmatpush3.bf16.msra.mxu1 %v1746_v51  ;;  %1572 = vmatprep.mubr.msk.bf16.mxu1 %vm1886_vm1, %v1885_v25 }
 0x24b   :  { %1558 = vmatprep.subr.bf16.mxu1 %v1885_v25 }
 0x24e   :  { %1559 = vmatpush3.bf16.msra.mxu1 %v1747_v53 }
 0x24f   :  { %1560 = vmatprep.subr.bf16.mxu1 %v1885_v25 }
 0x252   :  { %1561 = vmatpush3.bf16.msra.mxu1 %v1748_v58 }
 0x253   :  { %1562 = vmatprep.subr.bf16.mxu1 %v1885_v25 }
 0x256   :  { %1563 = vmatpush3.bf16.msra.mxu1 %v1749_v59 }
 0x257   :  { %1564 = vmatprep.subr.bf16.mxu1 %v1885_v25 }
 0x25a   :  { %1565 = vmatpush3.bf16.msra.mxu1 %v1750_v61 }
 0x25b   :  { %1566 = vmatprep.subr.bf16.mxu1 %v1885_v25 }
 0x25e   :  { %1567 = vmatpush3.bf16.msra.mxu1 %v1751_v54 }
 0x25f   :  { %1568 = vmatprep.subr.bf16.mxu1 %v1885_v25 }
 0x262   :  { %1569 = vmatpush3.bf16.msra.mxu1 %v1752_v55 }
 0x263   :  { %1570 = vmatprep.subr.bf16.mxu1 %v1885_v25 }
 0x266   :  { %1571 = vmatpush3.bf16.msra.mxu1 %v1753_v56 }
 0x269   :  { %1573 = vmatmul.mubr.bf16.vlgmr.msra.gmra.mrb[16].mxu1 %v1052_v60 }
 0x31c   :  { %v1541_v62 = vpop.f32.mrb[12].mxu1 }
 0x31d   :  { %v1542_v63 = vpop.f32.mrb[13].mxu1 }
 0x31e   :  { %v1543_v0 = vadd.f32 %v1542_v63, %v1541_v62  ;;  %v1544_v1 = vpop.f32.mrb[14].mxu1 }
 0x31f   :  { %v1545_v2 = vpop.f32.mrb[15].mxu1 }
 0x320   :  { %v1287_v4 = vadd.f32 %v1543_v0, %v1456_v3 }
 0x33c   :  { %v1326_v5 = vpop.f32.mrb[16].mxu1 }
 0x33d   :  { %v1327_v6 = vadd.f32 %v1326_v5, %v1287_v4  ;;  %v1574_v7 = vpop.f32.mrb[17].mxu1 }
 0x33e   :  { %v1329_v8 = vpop.f32.mrb[18].mxu1 }
 0x33f   :  { %1754 = vtanh.f32 %v1327_v6  ;;  %v1575_v9 = vpop.f32.mrb[19].mxu1 }
 0x349   :  { %v1755_v11 = vpop.eup %1754 }
 0x34a   :  { %v1334_v12 = vmul.f32 %v1755_v11, %v1333_v10 }
 0x34c   :  { %v1335_v13 = vpack.c.bf16 %v1334_v12, %v1334_v12 }
 0x34e   :  { %1336 = vst [vmem:[#allocation11] sm:$0xf] %v1335_v13 }
 0x34f   :  { %1855 = shalt.err (!%p1852_p8)
}
 0x350   :  { %s1856_s19 = scalar_lea.hbm %s2040_s8, 64 }
 0x351   :  { %p1857_p9 = scmp.ne.s32.totalorder %s2040_s8, %s1856_s19  ;;  %p1860_p10 = scmp.lt.u32.totalorder %s1856_s19, %s2040_s8 }
 0x353   :  { %p1862_p11 = pnand %p1860_p10, %p1857_p9 }
 0x355   :  { %1865 = shalt.err (!%p1862_p11)
}
 0x356   :  { %1346 = dma.vmem_to_hbm [thread:$0]  %s1344_s17, 64, %s2040_s8, [#allocation5]  }
 0x357   :  { %1872 = dma.done.wait [#allocation5], 64  }
 0x358   :  { %1873 = vsyncadd [#allocation5], 4294967232 }
 0x359   :  { %1350 = vsyncpa [#allocation4], 1 }
 0x35a   :  { %1351 = vsyncpa [#allocation7], 1 }
 0x35b   :  { %1352 = vsyncpa [#allocation10], 1 }
 0x35c   :  { %1353 = vsyncpa [#allocation5], 1 }

</bundles_post_ra>
